<compile_context>
chip_gen: v7x
topology: tpu7x:2x2x1
jax: 0.10.0
libtpu: 0.0.40
codegen_flags: <defaults>
</compile_context>

<pallas_src>
import functools

import jax
import jax.numpy as jnp
import numpy as np
from jax import lax
from jax.experimental import pallas as pl
from jax.experimental.pallas import tpu as pltpu

KSIZE = 7                 # SpatialAttention kernel_size (default)
PAD = KSIZE // 2          # = 3


def cbam_kernel(x_ref, w1_ref, w2_ref, t_ref, o_ref, *, inv_hw):
    """Processes one (Bt, C, HWp) block (Bt batch elements at a time).

    x_ref : (Bt, C, HWp)   NCHW input, spatial dims flattened onto lanes (zero-padded)
    w1_ref: (C, Cr)        channel-MLP 1st 1x1 conv weight, pre-transposed
    w2_ref: (Cr, C)        channel-MLP 2nd 1x1 conv weight, pre-transposed
    t_ref : (2*HWp, HWp)   full 2-D conv Toeplitz operator ([avg ; max] input rows)
    o_ref : (Bt, C, HWp)   output
    """
    is_bf16 = x_ref.dtype == jnp.bfloat16
    cdt = jnp.bfloat16 if is_bf16 else jnp.float32
    x = x_ref[...].astype(cdt)                                           # (Bt, C, HWp)
    inv_c = 1.0 / x.shape[1]

    # ---- Channel attention: GAP -> 1x1 conv -> ReLU -> 1x1 conv -> sigmoid
    # (avg-pool branch only, exactly matching the reference PyTorch module).
    pooled = jnp.sum(x, axis=2, dtype=jnp.float32) * inv_hw              # (Bt, C)
    hidden = jnp.maximum(
        jnp.dot(pooled, w1_ref[...], preferred_element_type=jnp.float32), 0.0)   # (Bt, Cr)
    ca = jax.nn.sigmoid(
        jnp.dot(hidden, w2_ref[...], preferred_element_type=jnp.float32))        # (Bt, C)
    out1 = x * ca.astype(cdt)[:, :, None]                                # (Bt, C, HWp)

    # ---- Spatial attention: channel mean/max -> 7x7 conv (one Toeplitz matmul) -> sigmoid
    avg = jnp.sum(out1, axis=1, dtype=jnp.float32) * inv_c               # (Bt, HWp)
    mx = jnp.max(out1, axis=1).astype(jnp.float32)                       # (Bt, HWp)
    comb = jnp.concatenate([avg, mx], axis=1)                            # (Bt, 2*HWp)
    sa = jax.nn.sigmoid(
        jnp.dot(comb, t_ref[...], preferred_element_type=jnp.float32))   # (Bt, HWp)

    o_ref[...] = (out1 * sa.astype(cdt)[:, None, :]).astype(o_ref.dtype)


def _build_full_toeplitz(wsp_t, H, W, HWp):
    """Full 2-D conv operator so that conv(comb)[o] == (comb_flat @ T_full)[o].

    T_full[c*HWp + (hi*W+wi), ho*W+wo] = weight[0, c, hi-ho+PAD, wi-wo+PAD]
    (zero outside the 7x7 support / outside the real HxW map — this also makes the
    zero rows/cols for the HW->HWp lane padding).
    """
    taps = jnp.asarray(wsp_t, jnp.float32).reshape(2, KSIZE, KSIZE)      # (2, 7, 7)

    ho = jnp.arange(H)[:, None]
    hi = jnp.arange(H)[None, :]
    dh = hi - ho                                                         # (H, H)
    row_valid = (jnp.abs(dh) <= PAD).astype(jnp.float32)
    dh_idx = jnp.clip(dh + PAD, 0, KSIZE - 1)

    wo = jnp.arange(W)[:, None]
    wi = jnp.arange(W)[None, :]
    dw = wi - wo                                                         # (W, W)
    col_valid = (jnp.abs(dw) <= PAD).astype(jnp.float32)
    dw_idx = jnp.clip(dw + PAD, 0, KSIZE - 1)

    vals = taps[:, dh_idx]                       # (2, H, H, 7)   [c, ho, hi, kw]
    vals = vals[:, :, :, dw_idx]                 # (2, H, H, W, W)[c, ho, hi, wo, wi]
    vals = vals * row_valid[None, :, :, None, None]
    vals = vals * col_valid[None, None, None, :, :]
    T = vals.transpose(0, 2, 4, 1, 3).reshape(2, H * W, H * W)           # [c, in, out]
    T = jnp.pad(T, ((0, 0), (0, HWp - H * W), (0, HWp - H * W)))
    return T.reshape(2 * HWp, HWp)


def cbam_pallas(x_nchw, w1_t, w2_t, wsp_t):
    """x_nchw: (B, C, H, W); weights in PyTorch layout:
       w1_t (Cr, C)   <- Conv2d(C, Cr, 1, bias=False)
       w2_t (C, Cr)   <- Conv2d(Cr, C, 1, bias=False)
       wsp_t (1, 2, 7, 7) <- Conv2d(2, 1, 7, padding=3, bias=False)
       Returns the NCHW output of CBAM.forward."""
    B, C, H, W = x_nchw.shape
    Cr = w1_t.shape[0]
    HW = H * W
    HWp = max(128, ((HW + 127) // 128) * 128)        # lane-dense last dim
    itemsize = np.dtype(x_nchw.dtype).itemsize

    # TODO(synk): for very large maps (H*W >~ 2048) the full Toeplitz grows as HW^2;
    # switch to a fused banded form (maps @ T_wide over 7 dy shifts) + H-tiled
    # two-pass (pooled prologue, 3-row-halo spatial pass) there.
    x = x_nchw.reshape(B, C, HW)                     # free (contiguous) reshape
    if HWp != HW:
        x = jnp.pad(x, ((0, 0), (0, 0), (0, HWp - HW)))

    w1 = jnp.asarray(w1_t, jnp.float32).T            # (C, Cr)
    w2 = jnp.asarray(w2_t, jnp.float32).T            # (Cr, C)
    t_full = _build_full_toeplitz(wsp_t, H, W, HWp)  # (2*HWp, HWp)

    # --- Generation-aware VMEM budget & batch-tile size.
    try:
        phys_vmem = int(getattr(pltpu.get_tpu_info(), "vmem_capacity_bytes",
                                128 * 2**20))
    except Exception:
        phys_vmem = 128 * 2**20
    small_vmem = phys_vmem <= 64 * 2**20             # v7x-class
    per_batch_bytes = C * HWp * itemsize
    target_block = (2 * 2**20) if small_vmem else (6 * 2**20)
    bt = max(1, min(B, target_block // max(per_batch_bytes, 1)))
    while B % bt:                                    # keep the grid exact
        bt -= 1

    block_bytes = bt * C * HWp * itemsize
    weight_bytes = 4 * (2 * HWp * HWp + 2 * C * Cr)
    cap = phys_vmem * 3 // 4                         # ~48 MiB v7x, ~96 MiB v5e/v6e
    vmem_limit = int(min(cap, max(32 * 2**20,
                                  4 * block_bytes + 2 * weight_bytes + (2 << 20))))

    cost = pl.CostEstimate(
        flops=int(B * (2 * C * HWp + 4 * C * Cr + 6 * C * HWp + 4 * HWp * HWp)),
        transcendentals=int(B * (C + HWp)),
        bytes_accessed=int(2 * B * C * HWp * itemsize + weight_bytes),
    )

    # TODO(synk): on v7x, single-buffer the four invariant operands
    # (pipeline_mode=pl.Buffered(1)) once large-W T matrices make it worthwhile.
    out = pl.pallas_call(
        functools.partial(cbam_kernel, inv_hw=1.0 / HW),
        out_shape=jax.ShapeDtypeStruct((B, C, HWp), x_nchw.dtype),
        grid=(B // bt,),
        in_specs=[
            pl.BlockSpec((bt, C, HWp), lambda b: (b, 0, 0)),
            pl.BlockSpec((C, Cr), lambda b: (0, 0)),
            pl.BlockSpec((Cr, C), lambda b: (0, 0)),
            pl.BlockSpec((2 * HWp, HWp), lambda b: (0, 0)),
        ],
        out_specs=pl.BlockSpec((bt, C, HWp), lambda b: (b, 0, 0)),
        compiler_params=pltpu.CompilerParams(
            dimension_semantics=("parallel",),       # batch tiles are independent
            vmem_limit_bytes=vmem_limit),
        cost_estimate=cost,
    )(x, w1, w2, t_full)

    if HWp != HW:
        out = out[:, :, :HW]
    return out.reshape(B, C, H, W)


def cbam_reference(x, w1_t, w2_t, wsp_t):
    """Pure-JAX NCHW reference matching the PyTorch module semantics."""
    pooled = jnp.mean(x, axis=(2, 3))                              # (B, C)
    hidden = jnp.maximum(pooled @ w1_t.T, 0.0)                     # (B, Cr)
    ca = jax.nn.sigmoid(hidden @ w2_t.T)                           # (B, C)
    out1 = x * ca[:, :, None, None]
    avg = jnp.mean(out1, axis=1, keepdims=True)
    mx = jnp.max(out1, axis=1, keepdims=True)
    comb = jnp.concatenate([avg, mx], axis=1)                      # (B, 2, H, W)
    sa = lax.conv_general_dilated(
        comb, wsp_t, window_strides=(1, 1), padding=[(PAD, PAD), (PAD, PAD)],
        dimension_numbers=("NCHW", "OIHW", "NCHW"))
    sa = jax.nn.sigmoid(sa)
    return out1 * sa


if __name__ == "__main__":
    B, C, H, W = 2, 32, 16, 16
    reduction = 16
    Cr = C // reduction

    key = jax.random.PRNGKey(0)
    kx, k1, k2, k3 = jax.random.split(key, 4)

    x = jax.random.normal(kx, (B, C, H, W), dtype=jnp.float32)
    # PyTorch Conv2d layouts, bias=False everywhere
    w1_t = jax.random.normal(k1, (Cr, C), dtype=jnp.float32) * 0.1   # Conv2d(C, Cr, 1)
    w2_t = jax.random.normal(k2, (C, Cr), dtype=jnp.float32) * 0.1   # Conv2d(Cr, C, 1)
    wsp_t = jax.random.normal(k3, (1, 2, KSIZE, KSIZE), dtype=jnp.float32) * 0.1

    out = jax.block_until_ready(cbam_pallas(x, w1_t, w2_t, wsp_t))
    ref = jax.block_until_ready(cbam_reference(x, w1_t, w2_t, wsp_t))
    np.testing.assert_allclose(np.asarray(out), np.asarray(ref), rtol=1e-3, atol=1e-3)

    print("KERNEL_OK")
</pallas_src>

<mosaic_0001>
module attributes {stable_mosaic.version = 11 : i64} {
  func.func @cbam_kernel(%arg0: i32, %arg1: memref<2x32x256xf32, #tpu.memory_space<vmem>>, %arg2: memref<32x2xf32, #tpu.memory_space<vmem>>, %arg3: memref<2x32xf32, #tpu.memory_space<vmem>>, %arg4: memref<512x256xf32, #tpu.memory_space<vmem>>, %arg5: memref<2x32x256xf32, #tpu.memory_space<vmem>>) attributes {dimension_semantics = [#tpu.dimension_semantics<parallel>], iteration_bounds = array<i64: 1>, scalar_prefetch = 0 : i64, scratch_operands = 0 : i64, tpu.core_type = #tpu.core_type<tc>, window_params = [{transform_indices = @transform_0, window_bounds = array<i64: 2, 32, 256>}, {pipeline_mode = #tpu.pipeline_mode<synchronous>, transform_indices = @transform_1, window_bounds = array<i64: 32, 2>}, {pipeline_mode = #tpu.pipeline_mode<synchronous>, transform_indices = @transform_2, window_bounds = array<i64: 2, 32>}, {pipeline_mode = #tpu.pipeline_mode<synchronous>, transform_indices = @transform_3, window_bounds = array<i64: 512, 256>}, {transform_indices = @transform_4, window_bounds = array<i64: 2, 32, 256>}]} {
    %c0 = arith.constant 0 : index
    %c0_0 = arith.constant 0 : index
    %c0_1 = arith.constant 0 : index
    %0 = vector.load %arg1[%c0, %c0_0, %c0_1] : memref<2x32x256xf32, #tpu.memory_space<vmem>>, vector<2x32x256xf32>
    %cst = arith.constant dense<0.000000e+00> : vector<2x32xf32>
    %1 = vector.multi_reduction <add>, %0, %cst [2] : vector<2x32x256xf32> to vector<2x32xf32>
    %cst_2 = arith.constant 3.906250e-03 : f32
    %2 = vector.broadcast %cst_2 : f32 to vector<2x32xf32>
    %3 = arith.mulf %1, %2 : vector<2x32xf32>
    %c0_3 = arith.constant 0 : index
    %c0_4 = arith.constant 0 : index
    %4 = vector.load %arg2[%c0_3, %c0_4] : memref<32x2xf32, #tpu.memory_space<vmem>>, vector<32x2xf32>
    %cst_5 = arith.constant dense<0.000000e+00> : vector<2x2xf32>
    %5 = tpu.matmul %3, %4, %cst_5 {dimension_numbers = #tpu.dot_dimension_numbers<[1], [0], [0], [1], [0, 0, 1, 1], [], []>} : vector<2x32xf32>, vector<32x2xf32>, vector<2x2xf32> -> vector<2x2xf32>
    %cst_6 = arith.constant 0.000000e+00 : f32
    %6 = vector.broadcast %cst_6 : f32 to vector<2x2xf32>
    %7 = arith.maximumf %5, %6 : vector<2x2xf32>
    %c0_7 = arith.constant 0 : index
    %c0_8 = arith.constant 0 : index
    %8 = vector.load %arg3[%c0_7, %c0_8] : memref<2x32xf32, #tpu.memory_space<vmem>>, vector<2x32xf32>
    %cst_9 = arith.constant dense<0.000000e+00> : vector<2x32xf32>
    %9 = tpu.matmul %7, %8, %cst_9 {dimension_numbers = #tpu.dot_dimension_numbers<[1], [0], [0], [1], [0, 0, 1, 1], [], []>} : vector<2x2xf32>, vector<2x32xf32>, vector<2x32xf32> -> vector<2x32xf32>
    %10 = arith.negf %9 : vector<2x32xf32>
    %11 = math.exp %10 : vector<2x32xf32>
    %cst_10 = arith.constant 1.000000e+00 : f32
    %12 = vector.broadcast %cst_10 : f32 to vector<2x32xf32>
    %13 = arith.addf %12, %11 : vector<2x32xf32>
    %14 = arith.divf %12, %13 : vector<2x32xf32>
    %15 = vector.shape_cast %14 : vector<2x32xf32> to vector<2x32x1xf32>
    %16 = vector.broadcast %15 : vector<2x32x1xf32> to vector<2x32x256xf32>
    %17 = arith.mulf %0, %16 : vector<2x32x256xf32>
    %cst_11 = arith.constant dense<0.000000e+00> : vector<2x256xf32>
    %18 = vector.multi_reduction <add>, %17, %cst_11 [1] : vector<2x32x256xf32> to vector<2x256xf32>
    %cst_12 = arith.constant 3.125000e-02 : f32
    %19 = vector.broadcast %cst_12 : f32 to vector<2x256xf32>
    %20 = arith.mulf %18, %19 : vector<2x256xf32>
    %cst_13 = arith.constant dense<0xFF800000> : vector<2x256xf32>
    %21 = vector.multi_reduction <maximumf>, %17, %cst_13 [1] : vector<2x32x256xf32> to vector<2x256xf32>
    %22 = tpu.concatenate %20, %21 in 1 : vector<2x256xf32>, vector<2x256xf32> -> vector<2x512xf32>
    %c0_14 = arith.constant 0 : index
    %c0_15 = arith.constant 0 : index
    %23 = vector.load %arg4[%c0_14, %c0_15] : memref<512x256xf32, #tpu.memory_space<vmem>>, vector<512x256xf32>
    %cst_16 = arith.constant dense<0.000000e+00> : vector<2x256xf32>
    %24 = tpu.matmul %22, %23, %cst_16 {dimension_numbers = #tpu.dot_dimension_numbers<[1], [0], [0], [1], [0, 0, 1, 1], [], []>} : vector<2x512xf32>, vector<512x256xf32>, vector<2x256xf32> -> vector<2x256xf32>
    %25 = arith.negf %24 : vector<2x256xf32>
    %26 = math.exp %25 : vector<2x256xf32>
    %cst_17 = arith.constant 1.000000e+00 : f32
    %27 = vector.broadcast %cst_17 : f32 to vector<2x256xf32>
    %28 = arith.addf %27, %26 : vector<2x256xf32>
    %29 = arith.divf %27, %28 : vector<2x256xf32>
    %30 = vector.shape_cast %29 : vector<2x256xf32> to vector<2x1x256xf32>
    %31 = vector.broadcast %30 : vector<2x1x256xf32> to vector<2x32x256xf32>
    %32 = arith.mulf %17, %31 : vector<2x32x256xf32>
    %c0_18 = arith.constant 0 : index
    %c0_19 = arith.constant 0 : index
    %c0_20 = arith.constant 0 : index
    %33 = vector.load %arg5[%c0_18, %c0_19, %c0_20] : memref<2x32x256xf32, #tpu.memory_space<vmem>>, vector<2x32x256xf32>
    tpu.vector_store %arg5[%c0_18, %c0_19, %c0_20], %32 {strides = array<i32>} : memref<2x32x256xf32, #tpu.memory_space<vmem>>, vector<2x32x256xf32>,
    return
  }
  func.func @transform_0(%arg0: i32) -> (i32, i32, i32) {
    %c0_i32 = arith.constant 0 : i32
    %c0_i32_0 = arith.constant 0 : i32
    %c0_i32_1 = arith.constant 0 : i32
    return %arg0, %c0_i32, %c0_i32_0 : i32, i32, i32
  }
  func.func @transform_1(%arg0: i32) -> (i32, i32) {
    %c0_i32 = arith.constant 0 : i32
    %c0_i32_0 = arith.constant 0 : i32
    %c0_i32_1 = arith.constant 0 : i32
    return %c0_i32, %c0_i32_0 : i32, i32
  }
  func.func @transform_2(%arg0: i32) -> (i32, i32) {
    %c0_i32 = arith.constant 0 : i32
    %c0_i32_0 = arith.constant 0 : i32
    %c0_i32_1 = arith.constant 0 : i32
    return %c0_i32, %c0_i32_0 : i32, i32
  }
  func.func @transform_3(%arg0: i32) -> (i32, i32) {
    %c0_i32 = arith.constant 0 : i32
    %c0_i32_0 = arith.constant 0 : i32
    %c0_i32_1 = arith.constant 0 : i32
    return %c0_i32, %c0_i32_0 : i32, i32
  }
  func.func @transform_4(%arg0: i32) -> (i32, i32, i32) {
    %c0_i32 = arith.constant 0 : i32
    %c0_i32_0 = arith.constant 0 : i32
    %c0_i32_1 = arith.constant 0 : i32
    return %arg0, %c0_i32, %c0_i32_0 : i32, i32, i32
  }
}

</mosaic_0001>

<bundles_post_ra>
// kernel: tpu_custom_call.1
= control target key start
LH: loop header
LB: loop body
LE: loop exit
PB: predicated region body
PF: predicated region fallthrough
CT: control target
= control target key end

     0   :  { %9 = vsyncpa [#allocation3], 0  ;;  %s1362_s0 = inlined_call_operand.hbm [shape: f32[2,32,256], index: 0, kind: input, shape index: {}]   ;;  %s1363_s1 = inlined_call_operand.vmem [shape: f32[32,2], index: 1, kind: input, shape index: {}]   ;;  %s1364_s2 = inlined_call_operand.vmem [shape: f32[2,32], index: 2, kind: input, shape index: {}]   ;;  %s1365_s3 = inlined_call_operand.hbm [shape: f32[512,256], index: 3, kind: input, shape index: {}]   ;;  %s1366_s4 = inlined_call_operand.hbm [shape: f32[2,32,256], index: 4, kind: output, shape index: {}]  }
   0x1   :  { %10 = vsyncpa [#allocation6], 0 }
   0x2   :  { %11 = vsyncpa [#allocation4], 0  ;;  %s1094_s15 = smov [#allocation2]   ;;  %s1022_s19 = scalar_lea.hbm %s1362_s0, 2048 }
   0x3   :  { %s17_s16 = sshll.u32 %s1094_s15, 4  ;;  %p1023_p0 = scmp.ne.s32.totalorder %s1362_s0, %s1022_s19  ;;  %s18_s16 = int_to_ptr.vmem [resolvable:$true] %s17_s16 }
   0x4   :  { %p1026_p1 = scmp.lt.u32.totalorder %s1022_s19, %s1362_s0 }
   0x6   :  { %p1028_p2 = pnand %p1026_p1, %p1023_p0 }
   0x8   :  { %1031 = shalt.err (!%p1028_p2)
}
   0x9   :  { %s1032_s24 = scalar_lea.vmem %s18_s16, 2048  ;;  %p1037_p4 = scmp.lt.s32.totalorder %s18_s16, %s18_s16 }
   0xa   :  { %p1033_p3 = scmp.ne.s32.totalorder %s18_s16, %s1032_s24  ;;  %p1038_p5 = scmp.lt.s32.totalorder %s1032_s24, %s1032_s24 }
   0xc   :  { %p1039_p6 = por %p1038_p5, %p1037_p4 }
   0xe   :  { %p1040_p7 = pnand %p1039_p6, %p1033_p3 }
  0x10   :  { %1043 = shalt.err (!%p1040_p7)
}
  0x11   :  { %s1095_s25 = smov 256   ;;  %s1096_s26 = smov 16  }
  0x12   :  { %23 = dma.hbm_to_vmem [thread:$0]  %s1362_s0, 2048, %s18_s16, [#allocation3], %s1095_s25, %s1095_s25, %s1096_s26  }
  0x13   :  { %s1097_s29 = smov [#allocation5]   ;;  %s1044_s7 = scalar_lea.hbm %s1365_s3, 16384 }
  0x14   :  { %s33_s30 = sshll.u32 %s1097_s29, 4  ;;  %p1045_p8 = scmp.ne.s32.totalorder %s1365_s3, %s1044_s7  ;;  %s34_s30 = int_to_ptr.vmem [resolvable:$true] %s33_s30 }
  0x15   :  { %p1048_p9 = scmp.lt.u32.totalorder %s1044_s7, %s1365_s3 }
  0x17   :  { %p1050_p10 = pnand %p1048_p9, %p1045_p8 }
  0x19   :  { %1053 = shalt.err (!%p1050_p10)
}
  0x1a   :  { %s1054_s12 = scalar_lea.vmem %s34_s30, 16384  ;;  %p1059_p12 = scmp.lt.s32.totalorder %s34_s30, %s34_s30 }
  0x1b   :  { %p1055_p11 = scmp.ne.s32.totalorder %s34_s30, %s1054_s12  ;;  %p1060_p13 = scmp.lt.s32.totalorder %s1054_s12, %s1054_s12 }
  0x1d   :  { %p1061_p0 = por %p1060_p13, %p1059_p12 }
  0x1f   :  { %p1062_p1 = pnand %p1061_p0, %p1055_p11 }
  0x21   :  { %1065 = shalt.err (!%p1062_p1)
}
  0x22   :  { %39 = dma.hbm_to_vmem [thread:$0]  %s1365_s3, 16384, %s34_s30, [#allocation6], %s1095_s25, %s1095_s25, %s1096_s26  }
  0x23   :  { %1088 = dma.done.wait [#allocation3], 2048  }
  0x24   :  { %1089 = vsyncadd [#allocation3], 4294965248 }
  0x25   :  { %1090 = dma.done.wait [#allocation6], 16384  }
  0x26   :  { %1091 = vsyncadd [#allocation6], 4294950912  ;;  %v1158_v0 = vld [vmem:[#allocation2 + $0x40] sm:$0xff]  ;;  %v1160_v1 = vld [vmem:[#allocation2 + $0x48] sm:$0xff]  ;;  %v1098_v27 = vmov 0.0|0.0   ;;  %vm1099_vm0 = vmmov 0   ;;  %v106_v32 = vlaneseq }
  0x27   :  { %v1162_v2 = vld [vmem:[#allocation2] sm:$0xff]  ;;  %v74_v3 = vadd.f32 %v1160_v1, %v1158_v0  ;;  %v1166_v4 = vld [vmem:[#allocation2 + $0x8] sm:$0xff]  ;;  %v1168_v5 = vld [vmem:[#allocation2 + $0x50] sm:$0xff]  ;;  %865 = vmatprep.subr.bf16.mxu0 %v1098_v27  ;;  %v1100_v31 = vmov 0.0   ;;  %vm117_vm1 = vcmask 130112   ;;  %vm124_vm2 = vcmask 195712  }
  0x28   :  { %v1170_v6 = vld [vmem:[#allocation2 + $0x58] sm:$0xff]  ;;  %v62_v7 = vadd.f32 %v1166_v4, %v1162_v2  ;;  %v1174_v8 = vld [vmem:[#allocation2 + $0x10] sm:$0xff]  ;;  %v1182_v12 = vld [vmem:[#allocation2 + $0x60] sm:$0xff]  ;;  %857 = vmatprep.mubr.msk.f32.mxu0 %vm1099_vm0, %v1100_v31  ;;  %860 = vmatprep.subr.mxu1 %v1100_v31  ;;  %v107_v34 = vand.u32 127, %v106_v32  ;;  %v1218_v39 = vshrl.u32 %v106_v32, 7  ;;  %vm131_vm3 = vcmask 261312  }
  0x29   :  { %v1176_v9 = vld [vmem:[#allocation2 + $0x18] sm:$0xff]  ;;  %75 = vadd.xlane.f32.xlu1 %v74_v3  ;;  %v77_v10 = vadd.f32 %v1170_v6, %v1168_v5  ;;  %v1184_v13 = vld [vmem:[#allocation2 + $0x68] sm:$0xff]  ;;  %v1186_v14 = vld [vmem:[#allocation2 + $0x20] sm:$0xff]  ;;  %862 = vmatprep.mubr.msk.f32.mxu1 %vm1099_vm0, %v1100_v31  ;;  %vm152_vm4 = vcmask 1041409   ;;  %vm154_vm5 = vcmask 261120   ;;  %vm233_vm6 = vcmask 1041408  }
  0x2a   :  { %63 = vadd.xlane.f32.xlu0 %v62_v7  ;;  %v65_v11 = vadd.f32 %v1176_v9, %v1174_v8  ;;  %v1188_v15 = vld [vmem:[#allocation2 + $0x28] sm:$0xff]  ;;  %v80_v16 = vadd.f32 %v1184_v13, %v1182_v12  ;;  %v1194_v18 = vld [vmem:[#allocation2 + $0x70] sm:$0xff]  ;;  %v1196_v19 = vld [vmem:[#allocation2 + $0x78] sm:$0xff]  ;;  %v112_v36 = vadd.s32 4294967288, %v107_v34  ;;  %v119_v38 = vadd.s32 4294967280, %v107_v34 }
  0x2b   :  { %v68_v17 = vadd.f32 %v1188_v15, %v1186_v14  ;;  %v1198_v20 = vld [vmem:[#allocation2 + $0x30] sm:$0xff]  ;;  %v1200_v21 = vld [vmem:[#allocation2 + $0x38] sm:$0xff]  ;;  %v83_v22 = vadd.f32 %v1196_v19, %v1194_v18  ;;  %v94_v24 = vld [vmem:[%s1363_s1] sm:$0xff]  ;;  %v126_v43 = vadd.s32 4294967272, %v107_v34  ;;  %v110_v47 = vsub.s32 %v107_v34, %v1218_v39 }
  0x2c   :  { %v71_v23 = vadd.f32 %v1200_v21, %v1198_v20  ;;  %v95_v25 = vld [vmem:[%s1363_s1 + $0x8] sm:$0xff]  ;;  %v96_v28 = vld [vmem:[%s1363_s1 + $0x10] sm:$0xff]  ;;  %v97_v29 = vld [vmem:[%s1363_s1 + $0x18] sm:$0xff]  ;;  %v115_v41 = vsub.s32 %v112_v36, %v1218_v39  ;;  %v122_v45 = vsub.s32 %v119_v38, %v1218_v39  ;;  %vm229_vm7 = vcmask 15360  }
  0x2d   :  { %78 = vadd.xlane.f32.xlu1 %v77_v10  ;;  %v866_v26 = vpack.c.bf16 %v95_v25, %v94_v24  ;;  %v869_v30 = vpack.c.bf16 %v97_v29, %v96_v28  ;;  %v129_v54 = vsub.s32 %v126_v43, %v1218_v39  ;;  %v228_v25 = vld [vmem:[%s1364_s2] sm:$0x3]  ;;  %v524_v29 = vld [vmem:[#allocation5 + $0x208] sm:$0xff]  ;;  %v530_v43 = vld [vmem:[#allocation5 + $0x238] sm:$0xff]  ;;  %s1102_s2 = smov [#allocation7]  }
  0x2e   :  { %66 = vadd.xlane.f32.xlu0 %v65_v11  ;;  %861 = vmatpush3.msk.msra.mxu1 %vm233_vm6, %v228_v25  ;;  %v523_v31 = vld [vmem:[#allocation5 + $0x200] sm:$0xff]  ;;  %v460_v34 = vld [vmem:[#allocation5 + $0x8] sm:$0xff]  ;;  %s823_s22 = sshll.u32 %s1102_s2, 4  ;;  %s824_s22 = int_to_ptr.vmem [resolvable:$true] %s823_s22 }
  0x2f   :  { %867 = vmatpush3.bf16.msra.mxu0 %v866_v26  ;;  %v459_v38 = vld [vmem:[#allocation5] sm:$0xff]  ;;  %s1066_s23 = scalar_lea.vmem %s824_s22, 2048  ;;  %p1071_p3 = scmp.lt.s32.totalorder %s824_s22, %s824_s22 }
  0x30   :  { %868 = vmatprep.subr.bf16.mxu0 %v1098_v27  ;;  %p1067_p2 = scmp.ne.s32.totalorder %s824_s22, %s1066_s23  ;;  %p1072_p4 = scmp.lt.s32.totalorder %s1066_s23, %s1066_s23 }
  0x31   :  { %81 = vadd.xlane.f32.xlu1 %v80_v16 }
  0x32   :  { %69 = vadd.xlane.f32.xlu0 %v68_v17  ;;  %p1073_p5 = por %p1072_p4, %p1071_p3 }
  0x33   :  { %870 = vmatpush3.bf16.msra.mxu0 %v869_v30  ;;  %v526_v30 = vld [vmem:[#allocation5 + $0x218] sm:$0xff] }
  0x34   :  { %v935_v32 = vpack.c.bf16 %v526_v30, %v524_v29  ;;  %v542_v29 = vld [vmem:[#allocation5 + $0x298] sm:$0xff]  ;;  %p1074_p6 = pnand %p1073_p5, %p1067_p2 }
  0x35   :  { %84 = vadd.xlane.f32.xlu1 %v83_v22 }
  0x36   :  { %72 = vadd.xlane.f32.xlu0 %v71_v23  ;;  %936 = vmatprep.subr.bf16.mxu1 %v935_v32  ;;  %v478_v32 = vld [vmem:[#allocation5 + $0x98] sm:$0xff] }
  0xb6   :  { %v76_v33 = vpop.xlane.xlu1 %75 }
  0xb7   :  { %v64_v35 = vpop.xlane.xlu0 %63  ;;  %v90_v48 = vmul.f32 0.00390625, %v76_v33  ;;  %v525_v33 = vld [vmem:[#allocation5 + $0x210] sm:$0xff] }
  0xb8   :  { %v86_v51 = vmul.f32 0.00390625, %v64_v35  ;;  %v462_v35 = vld [vmem:[#allocation5 + $0x18] sm:$0xff]  ;;  %v937_v36 = vpack.c.bf16 %v525_v33, %v523_v31  ;;  %v476_v31 = vld [vmem:[#allocation5 + $0x88] sm:$0xff] }
  0xb9   :  { %v136_v58 = vrot.slane %v90_v48, %v110_v47  ;;  %v464_v48 = vld [vmem:[#allocation5 + $0x28] sm:$0xff] }
  0xba   :  { %v79_v37 = vpop.xlane.xlu1 %78  ;;  %v111_v62 = vrot.slane %v86_v51, %v110_v47 }
  0xbb   :  { %v67_v40 = vpop.xlane.xlu0 %66  ;;  %v91_v42 = vmul.f32 0.00390625, %v79_v37  ;;  %v871_v37 = vpack.c.bf16 %v462_v35, %v460_v34  ;;  %v539_v35 = vld [vmem:[#allocation5 + $0x280] sm:$0xff] }
  0xbc   :  { %v87_v44 = vmul.f32 0.00390625, %v67_v40  ;;  %v461_v40 = vld [vmem:[#allocation5 + $0x10] sm:$0xff] }
  0xbd   :  { %v140_v53 = vrot.slane %v91_v42, %v115_v41  ;;  %v873_v42 = vpack.c.bf16 %v461_v40, %v459_v38  ;;  %872 = vmatprep.subr.bf16.mxu0 %v871_v37  ;;  %v475_v37 = vld [vmem:[#allocation5 + $0x80] sm:$0xff]  ;;  %v887_v38 = vpack.c.bf16 %v478_v32, %v476_v31  ;;  %v477_v40 = vld [vmem:[#allocation5 + $0x90] sm:$0xff] }
  0xbe   :  { %v82_v46 = vpop.xlane.xlu1 %81  ;;  %v116_v55 = vrot.slane %v87_v44, %v115_v41  ;;  %v528_v41 = vld [vmem:[#allocation5 + $0x228] sm:$0xff]  ;;  %v527_v44 = vld [vmem:[#allocation5 + $0x220] sm:$0xff] }
  0xbf   :  { %v92_v49 = vmul.f32 0.00390625, %v82_v46  ;;  %v70_v50 = vpop.xlane.xlu0 %69  ;;  %v141_v3 = vsel %vm117_vm1, %v140_v53, %v136_v58  ;;  %v939_v46 = vpack.c.bf16 %v530_v43, %v528_v41  ;;  %v532_v53 = vld [vmem:[#allocation5 + $0x248] sm:$0xff]  ;;  %v533_v58 = vld [vmem:[#allocation5 + $0x250] sm:$0xff] }
  0xc0   :  { %v88_v52 = vmul.f32 0.00390625, %v70_v50  ;;  %v118_v10 = vsel %vm117_vm1, %v116_v55, %v111_v62  ;;  %v463_v50 = vld [vmem:[#allocation5 + $0x20] sm:$0xff]  ;;  %v469_v62 = vld [vmem:[#allocation5 + $0x50] sm:$0xff]  ;;  %v544_v41 = vld [vmem:[#allocation5 + $0x2a8] sm:$0xff] }
  0xc1   :  { %v145_v56 = vrot.slane %v92_v49, %v122_v45  ;;  %v466_v49 = vld [vmem:[#allocation5 + $0x38] sm:$0xff]  ;;  %v480_v43 = vld [vmem:[#allocation5 + $0xa8] sm:$0xff] }
  0xc2   :  { %v85_v57 = vpop.xlane.xlu1 %84  ;;  %v123_v59 = vrot.slane %v88_v52, %v122_v45  ;;  %v529_v45 = vld [vmem:[#allocation5 + $0x230] sm:$0xff]  ;;  %v875_v51 = vpack.c.bf16 %v466_v49, %v464_v48  ;;  %v543_v48 = vld [vmem:[#allocation5 + $0x2a0] sm:$0xff] }
  0xc3   :  { %v93_v60 = vmul.f32 0.00390625, %v85_v57  ;;  %v73_v61 = vpop.xlane.xlu0 %72  ;;  %v146_v11 = vsel %vm124_vm2, %v145_v56, %v141_v3  ;;  %v941_v47 = vpack.c.bf16 %v529_v45, %v527_v44  ;;  %v465_v52 = vld [vmem:[#allocation5 + $0x30] sm:$0xff]  ;;  %v531_v57 = vld [vmem:[#allocation5 + $0x240] sm:$0xff]  ;;  %v482_v44 = vld [vmem:[#allocation5 + $0xb8] sm:$0xff] }
  0xc4   :  { %v89_v63 = vmul.f32 0.00390625, %v73_v61  ;;  %v125_v17 = vsel %vm124_vm2, %v123_v59, %v118_v10  ;;  %v877_v55 = vpack.c.bf16 %v465_v52, %v463_v50  ;;  %v468_v59 = vld [vmem:[#allocation5 + $0x48] sm:$0xff]  ;;  %v467_v61 = vld [vmem:[#allocation5 + $0x40] sm:$0xff]  ;;  %v538_v10 = vld [vmem:[#allocation5 + $0x278] sm:$0xff] }
  0xc5   :  { %v150_v7 = vrot.slane %v93_v60, %v129_v54  ;;  %v470_v60 = vld [vmem:[#allocation5 + $0x58] sm:$0xff]  ;;  %v545_v49 = vld [vmem:[#allocation5 + $0x2b0] sm:$0xff]  ;;  %v479_v50 = vld [vmem:[#allocation5 + $0xa0] sm:$0xff] }
  0xc6   :  { %v130_v16 = vrot.slane %v89_v63, %v129_v54  ;;  %v534_v54 = vld [vmem:[#allocation5 + $0x258] sm:$0xff]  ;;  %v945_v63 = vpack.c.bf16 %v533_v58, %v531_v57  ;;  %v879_v3 = vpack.c.bf16 %v470_v60, %v468_v59  ;;  %v481_v52 = vld [vmem:[#allocation5 + $0xb0] sm:$0xff]  ;;  %v957_v57 = vpack.c.bf16 %v545_v49, %v543_v48  ;;  %v547_v60 = vld [vmem:[#allocation5 + $0x2c0] sm:$0xff] }
  0xc7   :  { %v151_v22 = vsel %vm131_vm3, %v150_v7, %v146_v11  ;;  %v943_v56 = vpack.c.bf16 %v534_v54, %v532_v53  ;;  %v536_v7 = vld [vmem:[#allocation5 + $0x268] sm:$0xff]  ;;  %v535_v11 = vld [vmem:[#allocation5 + $0x260] sm:$0xff]  ;;  %v550_v54 = vld [vmem:[#allocation5 + $0x2d8] sm:$0xff]  ;;  %v893_v58 = vpack.c.bf16 %v481_v52, %v479_v50 }
  0xc8   :  { %v132_v23 = vsel %vm131_vm3, %v130_v16, %v125_v17  ;;  %v881_v16 = vpack.c.bf16 %v469_v62, %v467_v61  ;;  %v947_v17 = vpack.c.bf16 %v538_v10, %v536_v7  ;;  %v548_v53 = vld [vmem:[#allocation5 + $0x2c8] sm:$0xff]  ;;  %v549_v61 = vld [vmem:[#allocation5 + $0x2d0] sm:$0xff]  ;;  %v483_v62 = vld [vmem:[#allocation5 + $0xc0] sm:$0xff] }
  0xc9   :  { %v153_v24 = vsel %vm152_vm4, %v151_v22, %v132_v23  ;;  %v537_v22 = vld [vmem:[#allocation5 + $0x270] sm:$0xff]  ;;  %v472_v23 = vld [vmem:[#allocation5 + $0x68] sm:$0xff]  ;;  %v959_v59 = vpack.c.bf16 %v550_v54, %v548_v53  ;;  %v554_v10 = vld [vmem:[#allocation5 + $0x2f8] sm:$0xff] }
  0xca   :  { %858 = vmatmul.mubr.msk.f32.vlgmr.msra.gmra.mrb[0].mxu0 %vm154_vm5, %v153_v24  ;;  %v474_v24 = vld [vmem:[#allocation5 + $0x78] sm:$0xff]  ;;  %v949_v30 = vpack.c.bf16 %v537_v22, %v535_v11  ;;  %v552_v7 = vld [vmem:[#allocation5 + $0x2e8] sm:$0xff]  ;;  %v961_v11 = vpack.c.bf16 %v549_v61, %v547_v60  ;;  %v551_v22 = vld [vmem:[#allocation5 + $0x2e0] sm:$0xff] }
  0xcb   :  { %874 = vmatpush1.bf16.msra.mxu0 %v873_v42  ;;  %v883_v25 = vpack.c.bf16 %v474_v24, %v472_v23  ;;  %v546_v42 = vld [vmem:[#allocation5 + $0x2b8] sm:$0xff]  ;;  %v553_v23 = vld [vmem:[#allocation5 + $0x2f0] sm:$0xff]  ;;  %v560_v49 = vld [vmem:[#allocation5 + $0x328] sm:$0xff] }
  0xcc   :  { %876 = vmatprep.subr.bf16.mxu0 %v875_v51  ;;  %v891_v51 = vpack.c.bf16 %v482_v44, %v480_v43  ;;  %v965_v24 = vpack.c.bf16 %v553_v23, %v551_v22  ;;  %v492_v43 = vld [vmem:[#allocation5 + $0x108] sm:$0xff]  ;;  %v494_v44 = vld [vmem:[#allocation5 + $0x118] sm:$0xff]  ;;  %v559_v52 = vld [vmem:[#allocation5 + $0x320] sm:$0xff] }
  0xcd   :  { %v562_v50 = vld [vmem:[#allocation5 + $0x338] sm:$0xff]  ;;  %v561_v53 = vld [vmem:[#allocation5 + $0x330] sm:$0xff] }
  0xce   :  { %v973_v54 = vpack.c.bf16 %v561_v53, %v559_v52  ;;  %v497_v60 = vld [vmem:[#allocation5 + $0x130] sm:$0xff]  ;;  %v502_v22 = vld [vmem:[#allocation5 + $0x158] sm:$0xff]  ;;  %v507_v52 = vld [vmem:[#allocation5 + $0x180] sm:$0xff] }
  0xcf   :  { %878 = vmatpush1.bf16.msra.mxu0 %v877_v55  ;;  %v484_v55 = vld [vmem:[#allocation5 + $0xc8] sm:$0xff]  ;;  %v509_v53 = vld [vmem:[#allocation5 + $0x190] sm:$0xff] }
  0xd0   :  { %880 = vmatprep.subr.bf16.mxu0 %v879_v3  ;;  %v485_v3 = vld [vmem:[#allocation5 + $0xd0] sm:$0xff] }
  0xd3   :  { %882 = vmatpush1.bf16.msra.mxu0 %v881_v16  ;;  %v897_v16 = vpack.c.bf16 %v485_v3, %v483_v62  ;;  %v564_v62 = vld [vmem:[#allocation5 + $0x348] sm:$0xff] }
  0xd4   :  { %884 = vmatprep.subr.bf16.mxu0 %v883_v25 }
 0x19d   :  { %v223_v26 = vpop.f32.mrb[0].mxu0 }
 0x19e   :  { %v227_v27 = vmax.f32 %v223_v26, 0.0  ;;  %v859_v28 = vpop.f32.mrb[1].mxu0  ;;  %v471_v26 = vld [vmem:[#allocation5 + $0x60] sm:$0xff] }
 0x19f   :  { %v540_v28 = vld [vmem:[#allocation5 + $0x288] sm:$0xff] }
 0x1a0   :  { %863 = vmatmul.mubr.msk.f32.vlgmr.msra.gmra.mrb[0].mxu1 %vm229_vm7, %v227_v27  ;;  %v473_v27 = vld [vmem:[#allocation5 + $0x70] sm:$0xff]  ;;  %v951_v34 = vpack.c.bf16 %v542_v29, %v540_v28  ;;  %v488_v29 = vld [vmem:[#allocation5 + $0xe8] sm:$0xff] }
 0x1a1   :  { %938 = vmatpush1.bf16.msra.mxu1 %v937_v36  ;;  %v885_v33 = vpack.c.bf16 %v473_v27, %v471_v26  ;;  %v541_v36 = vld [vmem:[#allocation5 + $0x290] sm:$0xff] }
 0x1a2   :  { %940 = vmatprep.subr.bf16.mxu1 %v939_v46  ;;  %v953_v45 = vpack.c.bf16 %v541_v36, %v539_v35  ;;  %v889_v46 = vpack.c.bf16 %v477_v40, %v475_v37  ;;  %v556_v36 = vld [vmem:[#allocation5 + $0x308] sm:$0xff]  ;;  %v558_v37 = vld [vmem:[#allocation5 + $0x318] sm:$0xff]  ;;  %v555_v40 = vld [vmem:[#allocation5 + $0x300] sm:$0xff] }
 0x1a3   :  { %886 = vmatpush1.bf16.msra.mxu0 %v885_v33  ;;  %v487_v33 = vld [vmem:[#allocation5 + $0xe0] sm:$0xff] }
 0x1a4   :  { %888 = vmatprep.subr.bf16.mxu0 %v887_v38  ;;  %v967_v38 = vpack.c.bf16 %v558_v37, %v556_v36  ;;  %v506_v36 = vld [vmem:[#allocation5 + $0x178] sm:$0xff] }
 0x1a5   :  { %942 = vmatpush1.bf16.msra.mxu1 %v941_v47  ;;  %v955_v47 = vpack.c.bf16 %v546_v42, %v544_v41  ;;  %v557_v41 = vld [vmem:[#allocation5 + $0x310] sm:$0xff] }
 0x1a6   :  { %944 = vmatprep.subr.bf16.mxu1 %v943_v56  ;;  %v486_v56 = vld [vmem:[#allocation5 + $0xd8] sm:$0xff]  ;;  %v969_v42 = vpack.c.bf16 %v557_v41, %v555_v40  ;;  %v503_v40 = vld [vmem:[#allocation5 + $0x160] sm:$0xff]  ;;  %v505_v41 = vld [vmem:[#allocation5 + $0x170] sm:$0xff] }
 0x1a7   :  { %890 = vmatpush1.bf16.msra.mxu0 %v889_v46  ;;  %v491_v46 = vld [vmem:[#allocation5 + $0x100] sm:$0xff] }
 0x1a8   :  { %892 = vmatprep.subr.bf16.mxu0 %v891_v51  ;;  %v971_v51 = vpack.c.bf16 %v562_v50, %v560_v49  ;;  %v508_v49 = vld [vmem:[#allocation5 + $0x188] sm:$0xff]  ;;  %v510_v50 = vld [vmem:[#allocation5 + $0x198] sm:$0xff] }
 0x1a9   :  { %946 = vmatpush1.bf16.msra.mxu1 %v945_v63  ;;  %v895_v63 = vpack.c.bf16 %v486_v56, %v484_v55  ;;  %v496_v55 = vld [vmem:[#allocation5 + $0x128] sm:$0xff]  ;;  %v498_v56 = vld [vmem:[#allocation5 + $0x138] sm:$0xff] }
 0x1aa   :  { %948 = vmatprep.subr.bf16.mxu1 %v947_v17  ;;  %v963_v17 = vpack.c.bf16 %v554_v10, %v552_v7  ;;  %v563_v7 = vld [vmem:[#allocation5 + $0x340] sm:$0xff]  ;;  %v565_v10 = vld [vmem:[#allocation5 + $0x350] sm:$0xff] }
 0x1ab   :  { %894 = vmatpush1.bf16.msra.mxu0 %v893_v58  ;;  %v907_v58 = vpack.c.bf16 %v498_v56, %v496_v55  ;;  %v576_v55 = vld [vmem:[#allocation5 + $0x3a8] sm:$0xff]  ;;  %v578_v56 = vld [vmem:[#allocation5 + $0x3b8] sm:$0xff] }
 0x1ac   :  { %896 = vmatprep.subr.bf16.mxu0 %v895_v63  ;;  %v566_v63 = vld [vmem:[#allocation5 + $0x358] sm:$0xff] }
 0x1ad   :  { %950 = vmatpush1.bf16.msra.mxu1 %v949_v30  ;;  %v490_v30 = vld [vmem:[#allocation5 + $0xf8] sm:$0xff]  ;;  %v975_v3 = vpack.c.bf16 %v566_v63, %v564_v62  ;;  %v512_v62 = vld [vmem:[#allocation5 + $0x1a8] sm:$0xff] }
 0x1ae   :  { %952 = vmatprep.subr.bf16.mxu1 %v951_v34  ;;  %v899_v32 = vpack.c.bf16 %v490_v30, %v488_v29  ;;  %v489_v34 = vld [vmem:[#allocation5 + $0xf0] sm:$0xff]  ;;  %v568_v29 = vld [vmem:[#allocation5 + $0x368] sm:$0xff]  ;;  %v570_v30 = vld [vmem:[#allocation5 + $0x378] sm:$0xff] }
 0x1af   :  { %898 = vmatpush1.bf16.msra.mxu0 %v897_v16  ;;  %v901_v35 = vpack.c.bf16 %v489_v34, %v487_v33  ;;  %v977_v16 = vpack.c.bf16 %v565_v10, %v563_v7  ;;  %v569_v33 = vld [vmem:[#allocation5 + $0x370] sm:$0xff]  ;;  %v514_v63 = vld [vmem:[#allocation5 + $0x1b8] sm:$0xff]  ;;  %v511_v7 = vld [vmem:[#allocation5 + $0x1a0] sm:$0xff] }
 0x1b0   :  { %900 = vmatprep.subr.bf16.mxu0 %v899_v32  ;;  %v567_v32 = vld [vmem:[#allocation5 + $0x360] sm:$0xff]  ;;  %v513_v10 = vld [vmem:[#allocation5 + $0x1b0] sm:$0xff] }
 0x1b1   :  { %954 = vmatpush1.bf16.msra.mxu1 %v953_v45  ;;  %v903_v45 = vpack.c.bf16 %v494_v44, %v492_v43  ;;  %v981_v34 = vpack.c.bf16 %v569_v33, %v567_v32  ;;  %v572_v43 = vld [vmem:[#allocation5 + $0x388] sm:$0xff]  ;;  %v574_v44 = vld [vmem:[#allocation5 + $0x398] sm:$0xff] }
 0x1b2   :  { %956 = vmatprep.subr.bf16.mxu1 %v955_v47  ;;  %v493_v47 = vld [vmem:[#allocation5 + $0x110] sm:$0xff]  ;;  %v584_v32 = vld [vmem:[#allocation5 + $0x3e8] sm:$0xff]  ;;  %v586_v33 = vld [vmem:[#allocation5 + $0x3f8] sm:$0xff] }
 0x1b3   :  { %902 = vmatpush1.bf16.msra.mxu0 %v901_v35  ;;  %v905_v48 = vpack.c.bf16 %v493_v47, %v491_v46  ;;  %v504_v35 = vld [vmem:[#allocation5 + $0x168] sm:$0xff]  ;;  %v571_v46 = vld [vmem:[#allocation5 + $0x380] sm:$0xff]  ;;  %v573_v47 = vld [vmem:[#allocation5 + $0x390] sm:$0xff] }
 0x1b4   :  { %904 = vmatprep.subr.bf16.mxu0 %v903_v45  ;;  %v983_v45 = vpack.c.bf16 %v574_v44, %v572_v43  ;;  %v519_v43 = vld [vmem:[#allocation5 + $0x1e0] sm:$0xff]  ;;  %v521_v44 = vld [vmem:[#allocation5 + $0x1f0] sm:$0xff] }
 0x1b5   :  { %958 = vmatpush1.bf16.msra.mxu1 %v957_v57  ;;  %v1229_v57 = vsub.s32 0, %v1218_v39 }
 0x1b6   :  { %960 = vmatprep.subr.bf16.mxu1 %v959_v59  ;;  %v495_v59 = vld [vmem:[#allocation5 + $0x120] sm:$0xff] }
 0x1b7   :  { %906 = vmatpush1.bf16.msra.mxu0 %v905_v48  ;;  %v909_v61 = vpack.c.bf16 %v497_v60, %v495_v59  ;;  %v985_v48 = vpack.c.bf16 %v573_v47, %v571_v46  ;;  %v575_v59 = vld [vmem:[#allocation5 + $0x3a0] sm:$0xff]  ;;  %v577_v60 = vld [vmem:[#allocation5 + $0x3b0] sm:$0xff]  ;;  %v933_v46 = vpack.c.bf16 %v521_v44, %v519_v43 }
 0x1b8   :  { %908 = vmatprep.subr.bf16.mxu0 %v907_v58  ;;  %v987_v58 = vpack.c.bf16 %v578_v56, %v576_v55 }
 0x1b9   :  { %962 = vmatpush1.bf16.msra.mxu1 %v961_v11 }
 0x1ba   :  { %964 = vmatprep.subr.bf16.mxu1 %v963_v17  ;;  %v500_v17 = vld [vmem:[#allocation5 + $0x148] sm:$0xff] }
 0x1bb   :  { %910 = vmatpush1.bf16.msra.mxu0 %v909_v61  ;;  %v989_v61 = vpack.c.bf16 %v577_v60, %v575_v59 }
 0x1bd   :  { %966 = vmatpush1.bf16.msra.mxu1 %v965_v24  ;;  %v1233_v24 = vsub.s32 1, %v1218_v39 }
 0x1be   :  { %968 = vmatprep.subr.bf16.mxu1 %v967_v38  ;;  %v915_v38 = vpack.c.bf16 %v506_v36, %v504_v35  ;;  %v995_v35 = vpack.c.bf16 %v586_v33, %v584_v32  ;;  %v583_v36 = vld [vmem:[#allocation5 + $0x3e0] sm:$0xff] }
 0x1c1   :  { %970 = vmatpush1.bf16.msra.mxu1 %v969_v42  ;;  %v917_v42 = vpack.c.bf16 %v505_v41, %v503_v40  ;;  %v520_v40 = vld [vmem:[#allocation5 + $0x1e8] sm:$0xff] }
 0x1c2   :  { %972 = vmatprep.subr.bf16.mxu1 %v971_v51  ;;  %v919_v51 = vpack.c.bf16 %v510_v50, %v508_v49 }
 0x1c5   :  { %974 = vmatpush1.bf16.msra.mxu1 %v973_v54  ;;  %v921_v54 = vpack.c.bf16 %v509_v53, %v507_v52 }
 0x1c6   :  { %976 = vmatprep.subr.bf16.mxu1 %v975_v3  ;;  %v923_v3 = vpack.c.bf16 %v514_v63, %v512_v62 }
 0x1c9   :  { %978 = vmatpush1.bf16.msra.mxu1 %v977_v16  ;;  %v580_v16 = vld [vmem:[#allocation5 + $0x3c8] sm:$0xff] }
 0x273   :  { %v303_v25 = vpop.f32.mrb[0].mxu1 }
 0x274   :  { %v839_v26 = vmul.f32 -1.442695, %v303_v25  ;;  %v864_v27 = vpop.f32.mrb[1].mxu1  ;;  %v911_v25 = vpack.c.bf16 %v502_v22, %v500_v17  ;;  %v582_v17 = vld [vmem:[#allocation5 + $0x3d8] sm:$0xff] }
 0x275   :  { %v501_v27 = vld [vmem:[#allocation5 + $0x150] sm:$0xff]  ;;  %v991_v22 = vpack.c.bf16 %v582_v17, %v580_v16 }
 0x276   :  { %1010 = vpow2.f32 %v839_v26  ;;  %v499_v26 = vld [vmem:[#allocation5 + $0x140] sm:$0xff]  ;;  %912 = vmatprep.subr.bf16.mxu0 %v911_v25  ;;  %v581_v25 = vld [vmem:[#allocation5 + $0x3d0] sm:$0xff] }
 0x280   :  { %v1011_v28 = vpop.eup %1010 }
 0x281   :  { %v310_v31 = vadd.f32 1.0, %v1011_v28  ;;  %v913_v28 = vpack.c.bf16 %v501_v27, %v499_v26  ;;  %v516_v27 = vld [vmem:[#allocation5 + $0x1c8] sm:$0xff] }
 0x283   :  { %1012 = vrcp.f32 %v310_v31  ;;  %v979_v31 = vpack.c.bf16 %v570_v30, %v568_v29  ;;  %914 = vmatpush1.bf16.msra.mxu0 %v913_v28  ;;  %v518_v28 = vld [vmem:[#allocation5 + $0x1d8] sm:$0xff]  ;;  %v515_v29 = vld [vmem:[#allocation5 + $0x1c0] sm:$0xff] }
 0x284   :  { %916 = vmatprep.subr.bf16.mxu0 %v915_v38  ;;  %v927_v30 = vpack.c.bf16 %v518_v28, %v516_v27  ;;  %v585_v38 = vld [vmem:[#allocation5 + $0x3f0] sm:$0xff] }
 0x285   :  { %980 = vmatprep.subr.bf16.mxu1 %v979_v31  ;;  %v517_v31 = vld [vmem:[#allocation5 + $0x1d0] sm:$0xff]  ;;  %v997_v41 = vpack.c.bf16 %v585_v38, %v583_v36 }
 0x286   :  { %982 = vmatpush1.bf16.msra.mxu1 %v981_v34  ;;  %v929_v34 = vpack.c.bf16 %v517_v31, %v515_v29 }
 0x287   :  { %918 = vmatpush1.bf16.msra.mxu0 %v917_v42  ;;  %984 = vmatprep.subr.bf16.mxu1 %v983_v45  ;;  %v522_v42 = vld [vmem:[#allocation5 + $0x1f8] sm:$0xff] }
 0x288   :  { %920 = vmatprep.subr.bf16.mxu0 %v919_v51  ;;  %v931_v45 = vpack.c.bf16 %v522_v42, %v520_v40 }
 0x28a   :  { %986 = vmatpush1.bf16.msra.mxu1 %v985_v48 }
 0x28b   :  { %922 = vmatpush1.bf16.msra.mxu0 %v921_v54  ;;  %988 = vmatprep.subr.bf16.mxu1 %v987_v58 }
 0x28c   :  { %924 = vmatprep.subr.bf16.mxu0 %v923_v3 }
 0x28d   :  { %v1013_v11 = vpop.eup %1012 }
 0x28e   :  { %v316_v23 = vrot.slane %v1013_v11, %v1229_v57  ;;  %v1236_v37 = vrot.slane %v1013_v11, %v1233_v24  ;;  %990 = vmatpush1.bf16.msra.mxu1 %v989_v61  ;;  %v925_v11 = vpack.c.bf16 %v513_v10, %v511_v7 }
 0x28f   :  { %992 = vmatprep.subr.bf16.mxu1 %v991_v22 }
 0x290   :  { %322 = vbcast.lane.b32.xlu1 %v316_v23, 264  ;;  %318 = vbcast.lane.b32.xlu0 %v316_v23, 256 }
 0x291   :  { %926 = vmatpush1.bf16.msra.mxu0 %v925_v11 }
 0x292   :  { %928 = vmatprep.subr.bf16.mxu0 %v927_v30 }
 0x294   :  { %337 = vbcast.lane.b32.xlu1 %v1236_v37, 256  ;;  %326 = vbcast.lane.b32.xlu0 %v316_v23, 272 }
 0x295   :  { %930 = vmatpush1.bf16.msra.mxu0 %v929_v34 }
 0x296   :  { %932 = vmatprep.subr.bf16.mxu0 %v931_v45 }
 0x298   :  { %341 = vbcast.lane.b32.xlu1 %v1236_v37, 264  ;;  %330 = vbcast.lane.b32.xlu0 %v316_v23, 280  ;;  %v579_v23 = vld [vmem:[#allocation5 + $0x3c0] sm:$0xff] }
 0x299   :  { %v993_v26 = vpack.c.bf16 %v581_v25, %v579_v23  ;;  %934 = vmatpush1.bf16.msra.mxu0 %v933_v46 }
 0x29b   :  { %994 = vmatpush1.bf16.msra.mxu1 %v993_v26 }
 0x29c   :  { %345 = vbcast.lane.b32.xlu1 %v1236_v37, 272  ;;  %996 = vmatprep.subr.bf16.mxu1 %v995_v35 }
 0x29f   :  { %998 = vmatpush1.bf16.msra.mxu1 %v997_v41 }
 0x2a0   :  { %349 = vbcast.lane.b32.xlu1 %v1236_v37, 280 }
 0x302   :  { %v323_v47 = vpop.permute.xlu1 %322  ;;  %v319_v48 = vpop.permute.xlu0 %318 }
 0x303   :  { %v1243_v49 = vmul.f32 %v323_v47, %v1174_v8  ;;  %v1246_v50 = vmul.f32 %v323_v47, %v1176_v9  ;;  %v1249_v37 = vmul.f32 %v319_v48, %v1162_v2  ;;  %v1252_v51 = vmul.f32 %v319_v48, %v1166_v4 }
 0x305   :  { %v367_v8 = vadd.f32 %v1243_v49, %v1249_v37  ;;  %v376_v9 = vadd.f32 %v1246_v50, %v1252_v51  ;;  %v407_v2 = vmax.f32 %v1249_v37, %v1243_v49  ;;  %v416_v4 = vmax.f32 %v1252_v51, %v1246_v50 }
 0x306   :  { %v338_v52 = vpop.permute.xlu1 %337  ;;  %v327_v53 = vpop.permute.xlu0 %326 }
 0x307   :  { %v1255_v54 = vmul.f32 %v327_v53, %v1186_v14  ;;  %v1258_v55 = vmul.f32 %v327_v53, %v1188_v15 }
 0x309   :  { %v368_v61 = vadd.f32 %v367_v8, %v1255_v54  ;;  %v377_v62 = vadd.f32 %v376_v9, %v1258_v55  ;;  %v408_v63 = vmax.f32 %v407_v2, %v1255_v54  ;;  %v417_v3 = vmax.f32 %v416_v4, %v1258_v55 }
 0x30a   :  { %v342_v56 = vpop.permute.xlu1 %341  ;;  %v331_v58 = vpop.permute.xlu0 %330 }
 0x30b   :  { %v1269_v14 = vmul.f32 %v342_v56, %v1168_v5  ;;  %v1272_v15 = vmul.f32 %v342_v56, %v1170_v6  ;;  %v1275_v59 = vmul.f32 %v331_v58, %v1198_v20  ;;  %v1278_v60 = vmul.f32 %v331_v58, %v1200_v21 }
 0x30c   :  { %v1285_v5 = vmul.f32 %v338_v52, %v1158_v0  ;;  %v1288_v6 = vmul.f32 %v338_v52, %v1160_v1 }
 0x30d   :  { %v369_v20 = vadd.f32 %v368_v61, %v1275_v59  ;;  %v378_v7 = vadd.f32 %v377_v62, %v1278_v60  ;;  %v409_v21 = vmax.f32 %v408_v63, %v1275_v59  ;;  %v418_v10 = vmax.f32 %v417_v3, %v1278_v60 }
 0x30e   :  { %v346_v11 = vpop.permute.xlu1 %345  ;;  %v385_v16 = vadd.f32 %v1269_v14, %v1285_v5  ;;  %v394_v17 = vadd.f32 %v1272_v15, %v1288_v6  ;;  %v425_v27 = vmax.f32 %v1285_v5, %v1269_v14  ;;  %v434_v28 = vmax.f32 %v1288_v6, %v1272_v15 }
 0x30f   :  { %v1299_v0 = vmul.f32 %v346_v11, %v1182_v12  ;;  %v1302_v1 = vmul.f32 %v346_v11, %v1184_v13  ;;  %v370_v22 = vrot.slane %v369_v20, 4  ;;  %v379_v23 = vrot.slane %v378_v7, 4 }
 0x310   :  { %v410_v25 = vrot.slane %v409_v21, 4  ;;  %v419_v26 = vrot.slane %v418_v10, 4 }
 0x311   :  { %v386_v29 = vadd.f32 %v385_v16, %v1299_v0  ;;  %v395_v30 = vadd.f32 %v394_v17, %v1302_v1  ;;  %v371_v31 = vadd.f32 %v370_v22, %v369_v20  ;;  %v380_v12 = vadd.f32 %v379_v23, %v378_v7 }
 0x312   :  { %v411_v32 = vmax.f32 %v409_v21, %v410_v25  ;;  %v420_v33 = vmax.f32 %v418_v10, %v419_v26  ;;  %v350_v13 = vpop.permute.xlu1 %349  ;;  %v426_v34 = vmax.f32 %v425_v27, %v1299_v0  ;;  %v435_v35 = vmax.f32 %v434_v28, %v1302_v1 }
 0x313   :  { %v1313_v36 = vmul.f32 %v350_v13, %v1194_v18  ;;  %v1316_v38 = vmul.f32 %v350_v13, %v1196_v19  ;;  %v372_v40 = vrot.slane %v371_v31, 2  ;;  %v381_v41 = vrot.slane %v380_v12, 2 }
 0x314   :  { %v412_v42 = vrot.slane %v411_v32, 2  ;;  %v421_v43 = vrot.slane %v420_v33, 2 }
 0x315   :  { %v387_v44 = vadd.f32 %v386_v29, %v1313_v36  ;;  %v396_v45 = vadd.f32 %v395_v30, %v1316_v38  ;;  %v427_v46 = vmax.f32 %v426_v34, %v1313_v36  ;;  %v436_v47 = vmax.f32 %v435_v35, %v1316_v38 }
 0x316   :  { %v373_v48 = vadd.f32 %v372_v40, %v371_v31  ;;  %v382_v52 = vadd.f32 %v381_v41, %v380_v12  ;;  %v413_v19 = vmax.f32 %v411_v32, %v412_v42  ;;  %v422_v2 = vmax.f32 %v420_v33, %v421_v43 }
 0x317   :  { %v388_v53 = vrot.slane %v387_v44, 4  ;;  %v397_v18 = vrot.slane %v396_v45, 4  ;;  %v428_v8 = vrot.slane %v427_v46, 4  ;;  %v437_v9 = vrot.slane %v436_v47, 4 }
 0x318   :  { %v383_v62 = vrot.slane %v382_v52, 1  ;;  %v374_v63 = vrot.slane %v373_v48, 1  ;;  %v423_v10 = vrot.slane %v422_v2, 1  ;;  %v414_v11 = vrot.slane %v413_v19, 1 }
 0x319   :  { %v389_v4 = vadd.f32 %v388_v53, %v387_v44  ;;  %v398_v56 = vadd.f32 %v397_v18, %v396_v45  ;;  %v429_v58 = vmax.f32 %v427_v46, %v428_v8  ;;  %v438_v61 = vmax.f32 %v436_v47, %v437_v9 }
 0x31a   :  { %v384_v25 = vadd.f32 %v383_v62, %v382_v52  ;;  %v375_v26 = vadd.f32 %v374_v63, %v373_v48  ;;  %v424_v31 = vmax.f32 %v422_v2, %v423_v10  ;;  %v415_v12 = vmax.f32 %v413_v19, %v414_v11 }
 0x31b   :  { %v390_v3 = vrot.slane %v389_v4, 2  ;;  %v399_v20 = vrot.slane %v398_v56, 2  ;;  %v430_v7 = vrot.slane %v429_v58, 2  ;;  %v439_v21 = vrot.slane %v438_v61, 2 }
 0x31c   :  { %v404_v35 = vmul.f32 0.03125, %v384_v25  ;;  %v403_v40 = vmul.f32 0.03125, %v375_v26 }
 0x31d   :  { %v391_v16 = vadd.f32 %v390_v3, %v389_v4  ;;  %v431_v17 = vmax.f32 %v429_v58, %v430_v7  ;;  %v440_v22 = vmax.f32 %v438_v61, %v439_v21  ;;  %v400_v23 = vadd.f32 %v399_v20, %v398_v56 }
 0x31e   :  { %v1101_v61 = vmov 1966171168  }
 0x31f   :  { %v441_v27 = vrot.slane %v440_v22, 1  ;;  %v432_v28 = vrot.slane %v431_v17, 1  ;;  %v401_v29 = vrot.slane %v400_v23, 1  ;;  %v392_v30 = vrot.slane %v391_v16, 1 }
 0x320   :  { %v745_v62 = vunpack.c.l.s4 %v1101_v61 }
 0x321   :  { %v442_v32 = vmax.f32 %v440_v22, %v441_v27  ;;  %v433_v33 = vmax.f32 %v431_v17, %v432_v28  ;;  %v402_v13 = vadd.f32 %v401_v29, %v400_v23  ;;  %v393_v34 = vadd.f32 %v392_v30, %v391_v16 }
 0x322   :  { %v746_v63 = vunpack.c.0.s8 %v745_v62 }
 0x323   :  { %v456_v41 = vsel %vm152_vm4, %v442_v32, %v424_v31  ;;  %v455_v42 = vsel %vm152_vm4, %v433_v33, %v415_v12  ;;  %v406_v43 = vmul.f32 0.03125, %v402_v13  ;;  %v405_v44 = vmul.f32 0.03125, %v393_v34 }
 0x324   :  { %722 = vmatprep.mubr.f32.mxu1 %v456_v41  ;;  %v749_v20 = vsub.s32 %v746_v63, %v1218_v39 }
 0x325   :  { %723 = vmatmul.mubr.f32.vlgmr.msra.gmra.mrb[2].mxu1 %v455_v42  ;;  %v448_v45 = vsel %vm152_vm4, %v406_v43, %v404_v35  ;;  %v447_v46 = vsel %vm152_vm4, %v405_v44, %v403_v40 }
 0x326   :  { %651 = vmatprep.mubr.f32.mxu0 %v448_v45 }
 0x327   :  { %652 = vmatmul.mubr.f32.vlgmr.msra.gmra.mrb[2].mxu0 %v447_v46 }
 0x3f8   :  { %v724_v47 = vpop.f32.mrb[2].mxu1 }
 0x3f9   :  { %v726_v48 = vpop.f32.mrb[3].mxu1 }
 0x3fa   :  { %v653_v52 = vpop.f32.mrb[2].mxu0 }
 0x3fb   :  { %v725_v53 = vadd.f32 %v724_v47, %v653_v52  ;;  %v655_v18 = vpop.f32.mrb[3].mxu0 }
 0x3fc   :  { %v727_v8 = vadd.f32 %v726_v48, %v655_v18 }
 0x3fd   :  { %v840_v9 = vmul.f32 -1.442695, %v725_v53 }
 0x3fe   :  { %v841_v19 = vmul.f32 -1.442695, %v727_v8 }
 0x3ff   :  { %1014 = vpow2.f32 %v840_v9 }
 0x400   :  { %1016 = vpow2.f32 %v841_v19 }
 0x409   :  { %v1015_v2 = vpop.eup %1014 }
 0x40a   :  { %v1017_v4 = vpop.eup %1016  ;;  %v735_v56 = vadd.f32 1.0, %v1015_v2 }
 0x40b   :  { %v736_v58 = vadd.f32 1.0, %v1017_v4 }
 0x40c   :  { %1018 = vrcp.f32 %v735_v56 }
 0x40d   :  { %1020 = vrcp.f32 %v736_v58 }
 0x416   :  { %v1019_v3 = vpop.eup %1018 }
 0x417   :  { %v1021_v7 = vpop.eup %1020 }
 0x418   :  { %v743_v21 = vcombine.low %v1019_v3, %v1021_v7 }
 0x41a   :  { %v750_v10 = vrot.slane %v743_v21, %v749_v20 }
 0x41c   :  { %v751_v11 = vcombine.high %v750_v10, %v750_v10  ;;  %v758_v16 = vrot.slane %v750_v10, %v749_v20 }
 0x41e   :  { %v765_v17 = vrot.slane %v751_v11, %v749_v20  ;;  %v769_v22 = vrot.slane %v758_v16, %v1229_v57  ;;  %v773_v23 = vrot.slane %v758_v16, %v1233_v24 }
 0x420   :  { %v777_v25 = vrot.slane %v765_v17, %v1229_v57  ;;  %v781_v26 = vrot.slane %v765_v17, %v1233_v24  ;;  %v786_v27 = vmul.f32 %v769_v22, %v1249_v37  ;;  %v787_v28 = vmul.f32 %v773_v23, %v1252_v51 }
 0x421   :  { %v788_v39 = vmul.f32 %v769_v22, %v1243_v49  ;;  %v789_v29 = vmul.f32 %v773_v23, %v1246_v50  ;;  %v790_v30 = vmul.f32 %v769_v22, %v1255_v54  ;;  %v791_v31 = vmul.f32 %v773_v23, %v1258_v55 }
 0x422   :  { %v792_v12 = vmul.f32 %v769_v22, %v1275_v59  ;;  %v793_v57 = vmul.f32 %v773_v23, %v1278_v60  ;;  %v794_v24 = vmul.f32 %v777_v25, %v1285_v5  ;;  %v795_v37 = vmul.f32 %v781_v26, %v1288_v6  ;;  %802 = vst [vmem:[#allocation7] sm:$0xff] %v786_v27 }
 0x423   :  { %803 = vst [vmem:[#allocation7 + $0x8] sm:$0xff] %v787_v28  ;;  %v796_v49 = vmul.f32 %v777_v25, %v1269_v14  ;;  %v797_v50 = vmul.f32 %v781_v26, %v1272_v15  ;;  %v798_v51 = vmul.f32 %v777_v25, %v1299_v0  ;;  %v799_v54 = vmul.f32 %v781_v26, %v1302_v1 }
 0x424   :  { %804 = vst [vmem:[#allocation7 + $0x10] sm:$0xff] %v788_v39  ;;  %805 = vst [vmem:[#allocation7 + $0x18] sm:$0xff] %v789_v29  ;;  %v800_v55 = vmul.f32 %v777_v25, %v1313_v36  ;;  %v801_v59 = vmul.f32 %v781_v26, %v1316_v38 }
 0x425   :  { %806 = vst [vmem:[#allocation7 + $0x20] sm:$0xff] %v790_v30  ;;  %807 = vst [vmem:[#allocation7 + $0x28] sm:$0xff] %v791_v31 }
 0x426   :  { %808 = vst [vmem:[#allocation7 + $0x30] sm:$0xff] %v792_v12  ;;  %809 = vst [vmem:[#allocation7 + $0x38] sm:$0xff] %v793_v57 }
 0x427   :  { %810 = vst [vmem:[#allocation7 + $0x40] sm:$0xff] %v794_v24  ;;  %811 = vst [vmem:[#allocation7 + $0x48] sm:$0xff] %v795_v37 }
 0x428   :  { %812 = vst [vmem:[#allocation7 + $0x50] sm:$0xff] %v796_v49  ;;  %813 = vst [vmem:[#allocation7 + $0x58] sm:$0xff] %v797_v50 }
 0x429   :  { %814 = vst [vmem:[#allocation7 + $0x60] sm:$0xff] %v798_v51  ;;  %815 = vst [vmem:[#allocation7 + $0x68] sm:$0xff] %v799_v54 }
 0x42a   :  { %816 = vst [vmem:[#allocation7 + $0x70] sm:$0xff] %v800_v55  ;;  %817 = vst [vmem:[#allocation7 + $0x78] sm:$0xff] %v801_v59 }
 0x42b   :  { %1077 = shalt.err (!%p1074_p6)
}
 0x42c   :  { %s1078_s28 = scalar_lea.hbm %s1366_s4, 2048 }
 0x42d   :  { %p1079_p7 = scmp.ne.s32.totalorder %s1366_s4, %s1078_s28  ;;  %p1082_p8 = scmp.lt.u32.totalorder %s1078_s28, %s1366_s4 }
 0x42f   :  { %p1084_p9 = pnand %p1082_p8, %p1079_p7 }
 0x431   :  { %1087 = shalt.err (!%p1084_p9)
}
 0x432   :  { %829 = dma.vmem_to_hbm [thread:$0]  %s824_s22, 2048, %s1366_s4, [#allocation4], %s1095_s25, %s1095_s25, %s1096_s26  }
 0x433   :  { %1092 = dma.done.wait [#allocation4], 2048  }
 0x434   :  { %1093 = vsyncadd [#allocation4], 4294965248 }
 0x435   :  { %833 = vsyncpa [#allocation3], 1 }
 0x436   :  { %834 = vsyncpa [#allocation6], 1 }
 0x437   :  { %835 = vsyncpa [#allocation4], 1 }

</bundles_post_ra>
